<compile_context>
chip_gen: v7x
topology: tpu7x:2x2x1
jax: 0.10.0
libtpu: 0.0.40
codegen_flags: <defaults>
</compile_context>

<pallas_src>
import functools

import jax
import jax.numpy as jnp
from jax import lax
from jax.experimental import pallas as pl
from jax.experimental.pallas import tpu as pltpu

EPS = 1e-5


# --------------------------------- Pallas kernel ----------------------------------

def _conv_bn_relu_x2_kernel(x_ref, w1_ref, b1_ref, w2_ref, b2_ref, o_ref, *, H):
    """One row-block of (conv3x3 -> BN -> ReLU) x 2 on lane-dense slabs.

    x_ref : (Rb, W*Cin_pad)       bf16; rows = flattened (n, h), lanes = w*Cin_pad + ci
    w1_ref: (W*Cin_pad, 3*W*Cout) bf16 banded conv1 weights (BN1 folded), dy-major cols
    b1_ref: (1, W*Cout)           f32 folded bias, tiled over w
    w2_ref: (W*Cout, 3*W*Cout)    bf16 banded conv2 weights (BN2 folded)
    b2_ref: (1, W*Cout)           f32
    o_ref : (Rb, W*Cout)          f32 lane-dense output rows

    Row blocks are aligned to image boundaries (Rb % H == 0 or Rb == N*H), so the
    top/bottom masks below also neutralize the circular wrap of pltpu.roll at the
    block edges and any cross-image leakage inside the flat N*H dimension.
    """
    rows = o_ref.shape[0]
    WC = o_ref.shape[1]

    # Single (rows, 1) iota column; jnp.where broadcasts it across the lanes.
    row_in_img = jax.lax.broadcasted_iota(jnp.int32, (rows, 1), 0) % H
    not_top = row_in_img != 0            # dy=-1 neighbour is the zero-pad row
    not_bot = row_in_img != (H - 1)      # dy=+1 neighbour is the zero-pad row

    def conv3x3_bn_relu(inp, w_ref, b_ref):
        # One MXU matmul covers all 9 taps; K = W*C, N = 3*W*Cout (dy-major blocks).
        p = jnp.dot(inp, w_ref[...], preferred_element_type=jnp.float32)  # (rows, 3*WC)
        p0 = p[:, 0 * WC:1 * WC]   # dy=0 tap: contribution of input row h-1
        p1 = p[:, 1 * WC:2 * WC]   # dy=1 tap: contribution of input row h
        p2 = p[:, 2 * WC:3 * WC]   # dy=2 tap: contribution of input row h+1
        # Sublane rotations on the XLU (different VLIW slot -> overlaps with the MXU);
        # wrapped / cross-image rows are zeroed by the masks.
        down = pltpu.roll(p0, shift=1, axis=0)           # [g] = p0[g-1]
        up = pltpu.roll(p2, shift=rows - 1, axis=0)      # [g] = p2[g+1]
        acc = p1 + jnp.where(not_top, down, 0.0) + jnp.where(not_bot, up, 0.0)
        return jnp.maximum(acc + b_ref[...], 0.0)        # folded BN + ReLU, f32

    h1 = conv3x3_bn_relu(x_ref[...], w1_ref, b1_ref).astype(jnp.bfloat16)
    o_ref[...] = conv3x3_bn_relu(h1, w2_ref, b2_ref).astype(o_ref.dtype)


# ------------------------------ parameter preparation -----------------------------
# Pure layout plumbing; done ONCE, outside the jitted per-call path.

def _fold_bn(w_oihw, b, gamma, beta, mean, var):
    s = gamma / jnp.sqrt(var + EPS)                       # (Cout,)
    w = (w_oihw * s[:, None, None, None]).astype(jnp.float32)
    bias = (s * (b - mean) + beta).astype(jnp.float32)
    return w, bias


def _band_weights(w_oihw, W):
    """(Cout, Cin, 3, 3) folded weights -> (W*Cin, 3*W*Cout) banded matrix.

    Column block dy in {0,1,2}; inside a block, element
    [(w_in*Cin + ci), (w_out*Cout + co)] = w[co, ci, dy, dx] with w_in = w_out + dx - 1.
    Entries with w_in outside [0, W) are dropped -> zero padding along W folded in.
    """
    Cin = w_oihw.shape[1]
    mats = []
    for dy in range(3):
        m = jnp.zeros((W * Cin, W * w_oihw.shape[0]), jnp.float32)
        for dx in range(3):
            tap = jnp.transpose(w_oihw[:, :, dy, dx])              # (Cin, Cout)
            shift = jnp.eye(W, W, k=1 - dx, dtype=jnp.float32)     # [w_in, w_out]
            m = m + jnp.kron(shift, tap)
        mats.append(m)
    return jnp.concatenate(mats, axis=1)                           # (W*Cin, 3*W*Cout)


def _padded_cin(W, Cin):
    """Smallest Cin' >= Cin with (W*Cin') % 128 == 0 (bounded to avoid blowing up K)."""
    for c in range(Cin, Cin + 129):
        if (W * c) % 128 == 0:
            if c <= max(2 * Cin, Cin + 8):
                return c
            break
    return Cin


def prepare_conv_block_params(params, W):
    """BN fold (f32) + band construction + bias tiling; bf16 cast happens last."""
    Cin = params["w1"].shape[1]
    Cout = params["w1"].shape[0]
    Cin_pad = _padded_cin(W, Cin)

    w1f, b1f = _fold_bn(params["w1"], params["b1"], params["g1"], params["be1"],
                        params["m1"], params["v1"])
    w2f, b2f = _fold_bn(params["w2"], params["b2"], params["g2"], params["be2"],
                        params["m2"], params["v2"])
    if Cin_pad != Cin:  # zero-pad Cin so W*Cin fills 128-lane vregs / MXU K granule
        w1f = jnp.pad(w1f, ((0, 0), (0, Cin_pad - Cin), (0, 0), (0, 0)))

    return {
        "w1_band": _band_weights(w1f, W).astype(jnp.bfloat16),   # (W*Cin_pad, 3*W*Cout)
        "w2_band": _band_weights(w2f, W).astype(jnp.bfloat16),   # (W*Cout,   3*W*Cout)
        "b1_row": jnp.tile(b1f, W).reshape(1, W * Cout),          # f32, lane = w*Cout+co
        "b2_row": jnp.tile(b2f, W).reshape(1, W * Cout),          # f32
    }


# ---------------------------------- entry point ------------------------------------

def _pick_block_rows(N, H, target_rows):
    """Row-block size: multiple of H (image-aligned -> no inter-block halo needed),
    multiple of 8 sublanes (or the full slab), dividing N*H."""
    NH = N * H
    imgs = max(1, min(N, max(1, target_rows // H)))
    while imgs > 1 and N % imgs != 0:
        imgs -= 1
    rb = imgs * H
    if rb != NH and rb % 8 != 0:
        rb = NH
    return rb


def conv_block_pallas(x_nchw, prepped, *, target_block_rows=256):
    """Forward of the PyTorch `Conv` module. x_nchw: (N, Cin, H, W) f32 -> (N, Cout, H, W)."""
    N, Cin, H, W = x_nchw.shape
    Cin_pad = prepped["w1_band"].shape[0] // W
    Cout = prepped["b1_row"].shape[1] // W
    WCi, WCo = W * Cin_pad, W * Cout
    NH = N * H

    # NCHW -> lane-dense 2-D layout: rows = N*H, lanes = w*Cin_pad + ci. No spatial
    # jnp.pad: W padding lives in the band matrices, H padding is masked in-kernel.
    x_nhwc = jnp.transpose(x_nchw, (0, 2, 3, 1)).astype(jnp.float32)
    if Cin_pad != Cin:
        x_nhwc = jnp.pad(x_nhwc, ((0, 0), (0, 0), (0, 0), (0, Cin_pad - Cin)))
    x2d = x_nhwc.reshape(NH, WCi).astype(jnp.bfloat16)   # bf16 MXU operand

    rb = _pick_block_rows(N, H, target_block_rows)
    grid = (NH // rb,)

    out2d = pl.pallas_call(
        functools.partial(_conv_bn_relu_x2_kernel, H=H),
        out_shape=jax.ShapeDtypeStruct((NH, WCo), jnp.float32),
        grid_spec=pltpu.PrefetchScalarGridSpec(
            num_scalar_prefetch=0,
            grid=grid,
            in_specs=[
                # activations: one row-block per grid step (auto double-buffered DMA)
                pl.BlockSpec((rb, WCi), lambda i: (i, 0)),
                # weights / biases: constant block index -> fetched once, VMEM-resident
                pl.BlockSpec((WCi, 3 * WCo), lambda i: (0, 0)),
                pl.BlockSpec((1, WCo), lambda i: (0, 0)),
                pl.BlockSpec((WCo, 3 * WCo), lambda i: (0, 0)),
                pl.BlockSpec((1, WCo), lambda i: (0, 0)),
            ],
            out_specs=pl.BlockSpec((rb, WCo), lambda i: (i, 0)),
        ),
        compiler_params=pltpu.CompilerParams(
            dimension_semantics=("parallel",)),   # v7x: row blocks across both TCs
    )(x2d, prepped["w1_band"], prepped["b1_row"], prepped["w2_band"], prepped["b2_row"])

    return jnp.transpose(out2d.reshape(N, H, W, Cout), (0, 3, 1, 2))  # back to NCHW


# ------------------------------- pure-JAX reference --------------------------------

def conv_block_reference(x, params):
    """Pure-JAX f32 reference (same inference-BN semantics) for validation."""
    def conv(x, w, b):
        y = lax.conv_general_dilated(
            x, w, window_strides=(1, 1), padding=((1, 1), (1, 1)),
            dimension_numbers=("NCHW", "OIHW", "NCHW"),
            precision=lax.Precision.HIGHEST)
        return y + b[None, :, None, None]

    def bn(x, g, be, m, v):
        inv = g / jnp.sqrt(v + EPS)
        return x * inv[None, :, None, None] + (be - m * inv)[None, :, None, None]

    h = jax.nn.relu(bn(conv(x, params["w1"], params["b1"]),
                       params["g1"], params["be1"], params["m1"], params["v1"]))
    h = jax.nn.relu(bn(conv(h, params["w2"], params["b2"]),
                       params["g2"], params["be2"], params["m2"], params["v2"]))
    return h


if __name__ == "__main__":
    N, Cin, Cout, H, W = 2, 4, 8, 16, 16
    key = jax.random.PRNGKey(0)
    ks = jax.random.split(key, 14)

    # deterministic synthetic parameters (shapes match nn.Conv2d / nn.BatchNorm2d)
    params = {
        "w1": 0.1 * jax.random.normal(ks[0], (Cout, Cin, 3, 3), jnp.float32),
        "b1": 0.1 * jax.random.normal(ks[1], (Cout,), jnp.float32),
        "g1": 1.0 + 0.1 * jax.random.normal(ks[2], (Cout,), jnp.float32),
        "be1": 0.1 * jax.random.normal(ks[3], (Cout,), jnp.float32),
        "m1": 0.1 * jax.random.normal(ks[4], (Cout,), jnp.float32),
        "v1": 1.0 + 0.1 * jax.random.uniform(ks[5], (Cout,), jnp.float32),
        "w2": 0.1 * jax.random.normal(ks[6], (Cout, Cout, 3, 3), jnp.float32),
        "b2": 0.1 * jax.random.normal(ks[7], (Cout,), jnp.float32),
        "g2": 1.0 + 0.1 * jax.random.normal(ks[8], (Cout,), jnp.float32),
        "be2": 0.1 * jax.random.normal(ks[9], (Cout,), jnp.float32),
        "m2": 0.1 * jax.random.normal(ks[10], (Cout,), jnp.float32),
        "v2": 1.0 + 0.1 * jax.random.uniform(ks[11], (Cout,), jnp.float32),
    }
    x = jax.random.normal(ks[12], (N, Cin, H, W), jnp.float32)

    # BN fold / band construction / bias tiling hoisted out of the jitted path.
    prepped = prepare_conv_block_params(params, W)

    conv_fn = jax.jit(conv_block_pallas, static_argnames=("target_block_rows",))
    # target_block_rows=16 -> one image per grid step here (exercises the multi-step
    # grid + VMEM-resident weight path); at real shapes keep the ~256-512 row default.
    out = jax.block_until_ready(conv_fn(x, prepped, target_block_rows=16))
    ref = conv_block_reference(x, params)

    assert out.shape == (N, Cout, H, W), out.shape
    err = float(jnp.max(jnp.abs(out - ref)))
    # bf16 MXU operands (f32 accumulation) vs f32 reference -> relaxed tolerance.
    assert bool(jnp.allclose(out, ref, atol=4e-2, rtol=4e-2)), "max abs err = %s" % err
    print("KERNEL_OK")
</pallas_src>

<mosaic_0001>
module attributes {stable_mosaic.version = 11 : i64} {
  func.func @_conv_bn_relu_x2_kernel(%arg0: i32, %arg1: memref<16x128xbf16, #tpu.memory_space<vmem>>, %arg2: memref<128x384xbf16, #tpu.memory_space<vmem>>, %arg3: memref<1x128xf32, #tpu.memory_space<vmem>>, %arg4: memref<128x384xbf16, #tpu.memory_space<vmem>>, %arg5: memref<1x128xf32, #tpu.memory_space<vmem>>, %arg6: memref<16x128xf32, #tpu.memory_space<vmem>>) attributes {dimension_semantics = [#tpu.dimension_semantics<parallel>], iteration_bounds = array<i64: 2>, scalar_prefetch = 0 : i64, scratch_operands = 0 : i64, tpu.core_type = #tpu.core_type<tc>, window_params = [{transform_indices = @transform_0, window_bounds = array<i64: 16, 128>}, {pipeline_mode = #tpu.pipeline_mode<synchronous>, transform_indices = @transform_1, window_bounds = array<i64: 128, 384>}, {pipeline_mode = #tpu.pipeline_mode<synchronous>, transform_indices = @transform_2, window_bounds = array<i64: 1, 128>}, {pipeline_mode = #tpu.pipeline_mode<synchronous>, transform_indices = @transform_3, window_bounds = array<i64: 128, 384>}, {pipeline_mode = #tpu.pipeline_mode<synchronous>, transform_indices = @transform_4, window_bounds = array<i64: 1, 128>}, {transform_indices = @transform_5, window_bounds = array<i64: 16, 128>}]} {
    %0 = tpu.iota {dimensions = array<i32: 0>} : vector<16x1xi32>
    %c16_i32 = arith.constant 16 : i32
    %c0_i32 = arith.constant 0 : i32
    %1 = arith.cmpi eq, %c16_i32, %c0_i32 : i32
    %c1_i32 = arith.constant 1 : i32
    %2 = arith.select %1, %c1_i32, %c16_i32 : i32
    %3 = vector.broadcast %2 : i32 to vector<16x1xi32>
    %4 = arith.remsi %0, %3 : vector<16x1xi32>
    %c0_i32_0 = arith.constant 0 : i32
    %5 = vector.broadcast %c0_i32_0 : i32 to vector<16x1xi32>
    %6 = arith.cmpi ne, %4, %5 : vector<16x1xi32>
    %c0_i32_1 = arith.constant 0 : i32
    %7 = vector.broadcast %c0_i32_1 : i32 to vector<16x1xi32>
    %8 = arith.cmpi slt, %4, %7 : vector<16x1xi32>
    %c0_i32_2 = arith.constant 0 : i32
    %9 = arith.cmpi slt, %2, %c0_i32_2 : i32
    %10 = vector.broadcast %9 : i1 to vector<16x1xi1>
    %11 = vector.broadcast %10 : vector<16x1xi1> to vector<16x1xi1>
    %12 = arith.xori %8, %11 : vector<16x1xi1>
    %13 = arith.andi %12, %6 : vector<16x1xi1>
    %14 = vector.broadcast %2 : i32 to vector<16x1xi32>
    %15 = arith.addi %4, %14 : vector<16x1xi32>
    %16 = arith.select %13, %15, %4 : vector<16x1xi1>, vector<16x1xi32>
    %c0_i32_3 = arith.constant 0 : i32
    %17 = vector.broadcast %c0_i32_3 : i32 to vector<16x1xi32>
    %18 = arith.cmpi ne, %16, %17 : vector<16x1xi32>
    %c15_i32 = arith.constant 15 : i32
    %19 = vector.broadcast %c15_i32 : i32 to vector<16x1xi32>
    %20 = arith.cmpi ne, %16, %19 : vector<16x1xi32>
    %c0 = arith.constant 0 : index
    %c0_4 = arith.constant 0 : index
    %21 = vector.load %arg1[%c0, %c0_4] : memref<16x128xbf16, #tpu.memory_space<vmem>>, vector<16x128xbf16>
    %c0_5 = arith.constant 0 : index
    %c0_6 = arith.constant 0 : index
    %22 = vector.load %arg2[%c0_5, %c0_6] : memref<128x384xbf16, #tpu.memory_space<vmem>>, vector<128x384xbf16>
    %cst = arith.constant dense<0.000000e+00> : vector<16x384xf32>
    %23 = tpu.matmul %21, %22, %cst {dimension_numbers = #tpu.dot_dimension_numbers<[1], [0], [0], [1], [0, 0, 1, 1], [], []>} : vector<16x128xbf16>, vector<128x384xbf16>, vector<16x384xf32> -> vector<16x384xf32>
    %24 = vector.extract_strided_slice %23 {offsets = [0, 0], sizes = [16, 128], strides = [1, 1]} : vector<16x384xf32> to vector<16x128xf32>
    %25 = vector.extract_strided_slice %23 {offsets = [0, 128], sizes = [16, 128], strides = [1, 1]} : vector<16x384xf32> to vector<16x128xf32>
    %26 = vector.extract_strided_slice %23 {offsets = [0, 256], sizes = [16, 128], strides = [1, 1]} : vector<16x384xf32> to vector<16x128xf32>
    %c1_i32_7 = arith.constant 1 : i32
    %27 = tpu.dynamic_rotate %24 by %c1_i32_7 dim 0 : vector<16x128xf32>, i32 -> vector<16x128xf32>
    %c15_i32_8 = arith.constant 15 : i32
    %28 = tpu.dynamic_rotate %26 by %c15_i32_8 dim 0 : vector<16x128xf32>, i32 -> vector<16x128xf32>
    %cst_9 = arith.constant 0.000000e+00 : f32
    %29 = vector.shape_cast %18 : vector<16x1xi1> to vector<16x1xi1>
    %30 = vector.broadcast %29 : vector<16x1xi1> to vector<16x128xi1>
    %31 = vector.broadcast %cst_9 : f32 to vector<16x128xf32>
    %32 = arith.select %30, %27, %31 : vector<16x128xi1>, vector<16x128xf32>
    %33 = arith.addf %25, %32 : vector<16x128xf32>
    %cst_10 = arith.constant 0.000000e+00 : f32
    %34 = vector.shape_cast %20 : vector<16x1xi1> to vector<16x1xi1>
    %35 = vector.broadcast %34 : vector<16x1xi1> to vector<16x128xi1>
    %36 = vector.broadcast %cst_10 : f32 to vector<16x128xf32>
    %37 = arith.select %35, %28, %36 : vector<16x128xi1>, vector<16x128xf32>
    %38 = arith.addf %33, %37 : vector<16x128xf32>
    %c0_11 = arith.constant 0 : index
    %c0_12 = arith.constant 0 : index
    %39 = vector.load %arg3[%c0_11, %c0_12] : memref<1x128xf32, #tpu.memory_space<vmem>>, vector<1x128xf32>
    %40 = vector.broadcast %39 : vector<1x128xf32> to vector<16x128xf32>
    %41 = arith.addf %38, %40 : vector<16x128xf32>
    %cst_13 = arith.constant 0.000000e+00 : f32
    %42 = vector.broadcast %cst_13 : f32 to vector<16x128xf32>
    %43 = arith.maximumf %41, %42 : vector<16x128xf32>
    %44 = arith.truncf %43 : vector<16x128xf32> to vector<16x128xbf16>
    %c0_14 = arith.constant 0 : index
    %c0_15 = arith.constant 0 : index
    %45 = vector.load %arg4[%c0_14, %c0_15] : memref<128x384xbf16, #tpu.memory_space<vmem>>, vector<128x384xbf16>
    %cst_16 = arith.constant dense<0.000000e+00> : vector<16x384xf32>
    %46 = tpu.matmul %44, %45, %cst_16 {dimension_numbers = #tpu.dot_dimension_numbers<[1], [0], [0], [1], [0, 0, 1, 1], [], []>} : vector<16x128xbf16>, vector<128x384xbf16>, vector<16x384xf32> -> vector<16x384xf32>
    %47 = vector.extract_strided_slice %46 {offsets = [0, 0], sizes = [16, 128], strides = [1, 1]} : vector<16x384xf32> to vector<16x128xf32>
    %48 = vector.extract_strided_slice %46 {offsets = [0, 128], sizes = [16, 128], strides = [1, 1]} : vector<16x384xf32> to vector<16x128xf32>
    %49 = vector.extract_strided_slice %46 {offsets = [0, 256], sizes = [16, 128], strides = [1, 1]} : vector<16x384xf32> to vector<16x128xf32>
    %c1_i32_17 = arith.constant 1 : i32
    %50 = tpu.dynamic_rotate %47 by %c1_i32_17 dim 0 : vector<16x128xf32>, i32 -> vector<16x128xf32>
    %c15_i32_18 = arith.constant 15 : i32
    %51 = tpu.dynamic_rotate %49 by %c15_i32_18 dim 0 : vector<16x128xf32>, i32 -> vector<16x128xf32>
    %cst_19 = arith.constant 0.000000e+00 : f32
    %52 = vector.shape_cast %18 : vector<16x1xi1> to vector<16x1xi1>
    %53 = vector.broadcast %52 : vector<16x1xi1> to vector<16x128xi1>
    %54 = vector.broadcast %cst_19 : f32 to vector<16x128xf32>
    %55 = arith.select %53, %50, %54 : vector<16x128xi1>, vector<16x128xf32>
    %56 = arith.addf %48, %55 : vector<16x128xf32>
    %cst_20 = arith.constant 0.000000e+00 : f32
    %57 = vector.shape_cast %20 : vector<16x1xi1> to vector<16x1xi1>
    %58 = vector.broadcast %57 : vector<16x1xi1> to vector<16x128xi1>
    %59 = vector.broadcast %cst_20 : f32 to vector<16x128xf32>
    %60 = arith.select %58, %51, %59 : vector<16x128xi1>, vector<16x128xf32>
    %61 = arith.addf %56, %60 : vector<16x128xf32>
    %c0_21 = arith.constant 0 : index
    %c0_22 = arith.constant 0 : index
    %62 = vector.load %arg5[%c0_21, %c0_22] : memref<1x128xf32, #tpu.memory_space<vmem>>, vector<1x128xf32>
    %63 = vector.broadcast %62 : vector<1x128xf32> to vector<16x128xf32>
    %64 = arith.addf %61, %63 : vector<16x128xf32>
    %cst_23 = arith.constant 0.000000e+00 : f32
    %65 = vector.broadcast %cst_23 : f32 to vector<16x128xf32>
    %66 = arith.maximumf %64, %65 : vector<16x128xf32>
    %c0_24 = arith.constant 0 : index
    %c0_25 = arith.constant 0 : index
    %67 = vector.load %arg6[%c0_24, %c0_25] : memref<16x128xf32, #tpu.memory_space<vmem>>, vector<16x128xf32>
    tpu.vector_store %arg6[%c0_24, %c0_25], %66 {strides = array<i32>} : memref<16x128xf32, #tpu.memory_space<vmem>>, vector<16x128xf32>,
    return
  }
  func.func @transform_0(%arg0: i32) -> (i32, i32) {
    %c0_i32 = arith.constant 0 : i32
    %c0_i32_0 = arith.constant 0 : i32
    return %arg0, %c0_i32 : i32, i32
  }
  func.func @transform_1(%arg0: i32) -> (i32, i32) {
    %c0_i32 = arith.constant 0 : i32
    %c0_i32_0 = arith.constant 0 : i32
    %c0_i32_1 = arith.constant 0 : i32
    return %c0_i32, %c0_i32_0 : i32, i32
  }
  func.func @transform_2(%arg0: i32) -> (i32, i32) {
    %c0_i32 = arith.constant 0 : i32
    %c0_i32_0 = arith.constant 0 : i32
    %c0_i32_1 = arith.constant 0 : i32
    return %c0_i32, %c0_i32_0 : i32, i32
  }
  func.func @transform_3(%arg0: i32) -> (i32, i32) {
    %c0_i32 = arith.constant 0 : i32
    %c0_i32_0 = arith.constant 0 : i32
    %c0_i32_1 = arith.constant 0 : i32
    return %c0_i32, %c0_i32_0 : i32, i32
  }
  func.func @transform_4(%arg0: i32) -> (i32, i32) {
    %c0_i32 = arith.constant 0 : i32
    %c0_i32_0 = arith.constant 0 : i32
    %c0_i32_1 = arith.constant 0 : i32
    return %c0_i32, %c0_i32_0 : i32, i32
  }
  func.func @transform_5(%arg0: i32) -> (i32, i32) {
    %c0_i32 = arith.constant 0 : i32
    %c0_i32_0 = arith.constant 0 : i32
    return %arg0, %c0_i32 : i32, i32
  }
}

</mosaic_0001>

<bundles_post_ra>
// kernel: conv_block_pallas.1
= control target key start
LH: loop header
LB: loop body
LE: loop exit
PB: predicated region body
PF: predicated region fallthrough
CT: control target
= control target key end

     0   :  { %s1116_s18 = smov 0   ;;  %s1333_s0 = inlined_call_operand.vmem [shape: bf16[32,128], index: 0, kind: input, shape index: {}]   ;;  %s1334_s1 = inlined_call_operand.vmem [shape: bf16[128,384], index: 1, kind: input, shape index: {}]   ;;  %s1335_s2 = inlined_call_operand.vmem [shape: f32[1,128], index: 2, kind: input, shape index: {}]   ;;  %s1336_s3 = inlined_call_operand.vmem [shape: bf16[128,384], index: 3, kind: input, shape index: {}]   ;;  %s1337_s4 = inlined_call_operand.vmem [shape: f32[1,128], index: 4, kind: input, shape index: {}]   ;;  %s1338_s5 = inlined_call_operand.vmem [shape: f32[32,128], index: 5, kind: output, shape index: {}]  }
   0x1 LB: > { %s879_s19 = sadd.s32 4294967295, %s1081_s18   ;;  %p883_p0 = scmp.ge.s32.totalorder %s1081_s18, 1  ;;  %s1081_s18 = sphi %s1116_s18, %s15_s18  }
   0x2   : > { %p188_p1 = scmp.lt.s32.totalorder %s1081_s18, 3 }
   0x4   : > { %p189_p2 = pnand %p883_p0, %p188_p1 }
   0x5   : > { %v1010_v0 = vld [vmem:[%s1334_s1 + $0x4] ss:$12 sps:$4 sm:$0xff] (!%p189_p2)   ;;  %v1083_v1 = vmov (!%p189_p2), 0.0   ;;  %v1012_v2 = vld [vmem:[%s1334_s1 + $0x8] ss:$12 sps:$4 sm:$0xff] (!%p189_p2)   ;;  %vm1084_vm0 = vmmov (!%p189_p2), 0   ;;  %v229_v51 = vlaneseq (!%p189_p2) }
   0x6   : > { %192 = sbr.rel (%p189_p2) target bundleno = 494 (0x1ee), region = 40  ;;  %959 = vmatprep.subr.bf16.mxu1 (!%p189_p2), %v1083_v1  ;;  %975 = vmatprep.mubr.msk.bf16.mxu1 (!%p189_p2), %vm1084_vm0, %v1083_v1  ;;  %v1013_v3 = vld [vmem:[%s1334_s1] ss:$12 sps:$4 sm:$0xff] (!%p189_p2)   ;;  %s884_s26 = sshll.u32 (!%p189_p2), %s879_s19, 1  ;;  %v1014_v4 = vld [vmem:[%s1334_s1 + $0x1c] ss:$12 sps:$4 sm:$0xff] (!%p189_p2)  }
   0x7   : > { %428 = vmatprep.subr.bf16.mxu0 (!%p189_p2), %v1010_v0  ;;  %960 = vmatpush3.bf16.msra.mxu1 (!%p189_p2), %v1012_v2  ;;  %v1085_v5 = vmov (!%p189_p2), 0   ;;  %v1016_v6 = vld [vmem:[%s1334_s1 + $0x20] ss:$12 sps:$4 sm:$0xff] (!%p189_p2)   ;;  %v1017_v7 = vld [vmem:[%s1334_s1 + $0x18] ss:$12 sps:$4 sm:$0xff] (!%p189_p2)   ;;  %p217_p3 = scmp.lt.s32.totalorder (!%p189_p2), %s884_s26, 3 }
   0x8   : > { %460 = vmatprep.mubr.bf16.mxu0 (!%p189_p2), %v1085_v5  ;;  %429 = vmatpush1.bf16.msra.mxu0 (!%p189_p2), %v1013_v3  ;;  %v1018_v8 = vld [vmem:[%s1334_s1 + $0x34] ss:$12 sps:$4 sm:$0xff] (!%p189_p2)   ;;  %v1020_v9 = vld [vmem:[%s1334_s1 + $0x38] ss:$12 sps:$4 sm:$0xff] (!%p189_p2)   ;;  %v1021_v10 = vld [vmem:[%s1334_s1 + $0x30] ss:$12 sps:$4 sm:$0xff] (!%p189_p2)  }
   0x9   : > { %961 = vmatprep.subr.bf16.mxu1 (!%p189_p2), %v1083_v1  ;;  %430 = vmatprep.subr.bf16.mxu0 (!%p189_p2), %v1014_v4  ;;  %v1022_v11 = vld [vmem:[%s1334_s1 + $0x4c] ss:$12 sps:$4 sm:$0xff] (!%p189_p2)   ;;  %v1024_v12 = vld [vmem:[%s1334_s1 + $0x50] ss:$12 sps:$4 sm:$0xff] (!%p189_p2)   ;;  %v1025_v13 = vld [vmem:[%s1334_s1 + $0x48] ss:$12 sps:$4 sm:$0xff] (!%p189_p2)  }
   0xa   : > { %v1026_v14 = vld [vmem:[%s1334_s1 + $0x64] ss:$12 sps:$4 sm:$0xff] (!%p189_p2)   ;;  %v1028_v15 = vld [vmem:[%s1334_s1 + $0x68] ss:$12 sps:$4 sm:$0xff] (!%p189_p2)   ;;  %v1029_v16 = vld [vmem:[%s1334_s1 + $0x60] ss:$12 sps:$4 sm:$0xff] (!%p189_p2)  }
   0xb   : > { %962 = vmatpush3.bf16.msra.mxu1 (!%p189_p2), %v1016_v6  ;;  %v1030_v17 = vld [vmem:[%s1334_s1 + $0x7c] ss:$12 sps:$4 sm:$0xff] (!%p189_p2)   ;;  %v1032_v18 = vld [vmem:[%s1334_s1 + $0x80] ss:$12 sps:$4 sm:$0xff] (!%p189_p2)   ;;  %v1033_v19 = vld [vmem:[%s1334_s1 + $0x78] ss:$12 sps:$4 sm:$0xff] (!%p189_p2)  }
   0xc   : > { %431 = vmatpush1.bf16.msra.mxu0 (!%p189_p2), %v1017_v7  ;;  %963 = vmatprep.subr.bf16.mxu1 (!%p189_p2), %v1083_v1  ;;  %v1034_v20 = vld [vmem:[%s1334_s1 + $0x94] ss:$12 sps:$4 sm:$0xff] (!%p189_p2)   ;;  %v1036_v21 = vld [vmem:[%s1334_s1 + $0x98] ss:$12 sps:$4 sm:$0xff] (!%p189_p2)   ;;  %v1037_v22 = vld [vmem:[%s1334_s1 + $0x90] ss:$12 sps:$4 sm:$0xff] (!%p189_p2)  }
   0xd   : > { %432 = vmatprep.subr.bf16.mxu0 %v1018_v8  ;;  %s1344_s26 = smov (!%p217_p3, %s884_s26), 3  ;;  %v1038_v23 = vld [vmem:[%s1334_s1 + $0xac] ss:$12 sps:$4 sm:$0xff]   ;;  %v1040_v24 = vld [vmem:[%s1334_s1 + $0xb0] ss:$12 sps:$4 sm:$0xff]   ;;  %v230_v52 = vshrl.u32 %v229_v51, 7 }
   0xe   : > { %s885_s23 = sshll.u32 %s1344_s26, 2  ;;  %v1041_v25 = vld [vmem:[%s1334_s1 + $0xa8] ss:$12 sps:$4 sm:$0xff]   ;;  %v1045_v27 = vld [vmem:[%s1336_s3 + $0x4] ss:$12 sps:$4 sm:$0xff]   ;;  %s887_s9 = sshll.u32 %s1344_s26, 3 }
   0xf   : > { %964 = vmatpush3.bf16.msra.mxu1 %v1020_v9  ;;  %s220_s8 = scalar_lea.vmem %s1333_s0, %s885_s23  ;;  %v1046_v28 = vld [vmem:[%s1336_s3 + $0x8] ss:$12 sps:$4 sm:$0xff]   ;;  %v1043_v29 = vld [vmem:[%s1336_s3] ss:$12 sps:$4 sm:$0xff]   ;;  %v1047_v32 = vld [vmem:[%s1336_s3 + $0x18] ss:$12 sps:$4 sm:$0xff]   ;;  %s226_s11 = scalar_lea.vmem %s1338_s5, %s887_s9 }
  0x10   : > { %433 = vmatpush1.bf16.msra.mxu0 %v1021_v10  ;;  %965 = vmatprep.subr.bf16.mxu1 %v1083_v1  ;;  %v1042_v26 = vld [vmem:[%s220_s8] sm:$0xff]   ;;  %v1049_v30 = vld [vmem:[%s1336_s3 + $0x1c] ss:$12 sps:$4 sm:$0xff]   ;;  %v1057_v36 = vld [vmem:[%s1336_s3 + $0x4c] ss:$12 sps:$4 sm:$0xff]   ;;  %v231_v53 = vadd.s32 8, %v230_v52 }
  0x11   : > { %434 = vmatprep.subr.bf16.mxu0 %v1022_v11  ;;  %v1050_v31 = vld [vmem:[%s1336_s3 + $0x20] ss:$12 sps:$4 sm:$0xff]   ;;  %v1054_v34 = vld [vmem:[%s1336_s3 + $0x38] ss:$12 sps:$4 sm:$0xff]   ;;  %v1051_v35 = vld [vmem:[%s1336_s3 + $0x30] ss:$12 sps:$4 sm:$0xff]  }
  0x12   : > { %v1053_v33 = vld [vmem:[%s1336_s3 + $0x34] ss:$12 sps:$4 sm:$0xff]   ;;  %v1058_v37 = vld [vmem:[%s1336_s3 + $0x50] ss:$12 sps:$4 sm:$0xff]   ;;  %v1063_v43 = vld [vmem:[%s1336_s3 + $0x78] ss:$12 sps:$4 sm:$0xff]  }
  0x13   : > { %966 = vmatpush3.bf16.msra.mxu1 %v1024_v12  ;;  %v1055_v38 = vld [vmem:[%s1336_s3 + $0x48] ss:$12 sps:$4 sm:$0xff]   ;;  %v1061_v39 = vld [vmem:[%s1336_s3 + $0x64] ss:$12 sps:$4 sm:$0xff]   ;;  %v1059_v40 = vld [vmem:[%s1336_s3 + $0x60] ss:$12 sps:$4 sm:$0xff]  }
  0x14   : > { %435 = vmatpush1.bf16.msra.mxu0 %v1025_v13  ;;  %967 = vmatprep.subr.bf16.mxu1 %v1083_v1  ;;  %v1062_v41 = vld [vmem:[%s1336_s3 + $0x68] ss:$12 sps:$4 sm:$0xff]   ;;  %v1066_v44 = vld [vmem:[%s1336_s3 + $0x80] ss:$12 sps:$4 sm:$0xff]   ;;  %v1067_v46 = vld [vmem:[%s1336_s3 + $0x90] ss:$12 sps:$4 sm:$0xff]  }
  0x15   : > { %436 = vmatprep.subr.bf16.mxu0 %v1026_v14  ;;  %v1065_v42 = vld [vmem:[%s1336_s3 + $0x7c] ss:$12 sps:$4 sm:$0xff]   ;;  %v1069_v45 = vld [vmem:[%s1336_s3 + $0x94] ss:$12 sps:$4 sm:$0xff]   ;;  %v1070_v47 = vld [vmem:[%s1336_s3 + $0x98] ss:$12 sps:$4 sm:$0xff]  }
  0x16   : > { %v1073_v48 = vld [vmem:[%s1336_s3 + $0xac] ss:$12 sps:$4 sm:$0xff]   ;;  %v1071_v49 = vld [vmem:[%s1336_s3 + $0xa8] ss:$12 sps:$4 sm:$0xff]   ;;  %v1074_v50 = vld [vmem:[%s1336_s3 + $0xb0] ss:$12 sps:$4 sm:$0xff]  }
  0x17   : > { %968 = vmatpush3.bf16.msra.mxu1 %v1028_v15  ;;  %v243_v54 = vand.u32 15, %v231_v53  ;;  %v236_v56 = vand.u32 15, %v230_v52  ;;  %vm519_vm1 = vcmp.lt.s32.totalorder %v230_v52, 7  ;;  %vm514_vm2 = vcmp.lt.s32.totalorder %v230_v52, 1  ;;  %v913_v14 = vld [vmem:[%s1335_s2] ss:$0 sm:$0xff] }
  0x18   : > { %437 = vmatpush1.bf16.msra.mxu0 %v1029_v16  ;;  %969 = vmatprep.subr.bf16.mxu1 %v1083_v1 }
  0x19   : > { %438 = vmatprep.subr.bf16.mxu0 %v1030_v17  ;;  %vm1296_vm3 = vcmp.ne.s32.totalorder %v243_v54, 15  ;;  %vm1300_vm4 = vcmp.ne.s32.totalorder %v236_v56, 0 }
  0x1b   : > { %970 = vmatpush3.bf16.msra.mxu1 %v1032_v18 }
  0x1c   : > { %439 = vmatpush1.bf16.msra.mxu0 %v1033_v19  ;;  %971 = vmatprep.subr.bf16.mxu1 %v1083_v1 }
  0x1d   : > { %440 = vmatprep.subr.bf16.mxu0 %v1034_v20 }
  0x1f   : > { %972 = vmatpush3.bf16.msra.mxu1 %v1036_v21 }
  0x20   : > { %441 = vmatpush1.bf16.msra.mxu0 %v1037_v22  ;;  %973 = vmatprep.subr.bf16.mxu1 %v1083_v1 }
  0x21   : > { %442 = vmatprep.subr.bf16.mxu0 %v1038_v23 }
  0x23   : > { %974 = vmatpush3.bf16.msra.mxu1 %v1040_v24 }
  0x24   : > { %443 = vmatpush1.bf16.msra.mxu0 %v1041_v25  ;;  %979 = vmatprep.subr.bf16.mxu1 %v1083_v1 }
  0x25   : > { %710 = vmatprep.subr.bf16.mxu0 %v1045_v27 }
  0x26   : > { %976 = vmatmul.mubr.bf16.vlgmr.msra.gmra.mrb[0].mxu1 %v1042_v26 }
  0x27   : > { %461 = vmatmul.mubr.bf16.vlgmr.msra.gmra.mrb[0].mxu0 %v1042_v26  ;;  %980 = vmatpush3.bf16.msra.mxu1 %v1046_v28 }
  0x28   : > { %711 = vmatpush1.bf16.msra.mxu0 %v1043_v29  ;;  %981 = vmatprep.subr.bf16.mxu1 %v1083_v1 }
  0x29   : > { %712 = vmatprep.subr.bf16.mxu0 %v1049_v30  ;;  %742 = vmatprep.mubr.bf16.mxu0 %v1085_v5 }
  0x2a   : > { %995 = vmatprep.mubr.msk.bf16.mxu1 %vm1084_vm0, %v1083_v1 }
  0x2b   : > { %982 = vmatpush3.bf16.msra.mxu1 %v1050_v31 }
  0x2c   : > { %713 = vmatpush1.bf16.msra.mxu0 %v1047_v32  ;;  %983 = vmatprep.subr.bf16.mxu1 %v1083_v1 }
  0x2d   : > { %714 = vmatprep.subr.bf16.mxu0 %v1053_v33 }
  0x2f   : > { %984 = vmatpush3.bf16.msra.mxu1 %v1054_v34 }
  0x30   : > { %715 = vmatpush1.bf16.msra.mxu0 %v1051_v35  ;;  %985 = vmatprep.subr.bf16.mxu1 %v1083_v1 }
  0x31   : > { %716 = vmatprep.subr.bf16.mxu0 %v1057_v36 }
  0x33   : > { %986 = vmatpush3.bf16.msra.mxu1 %v1058_v37 }
  0x34   : > { %717 = vmatpush1.bf16.msra.mxu0 %v1055_v38  ;;  %987 = vmatprep.subr.bf16.mxu1 %v1083_v1 }
  0x35   : > { %718 = vmatprep.subr.bf16.mxu0 %v1061_v39 }
  0x37   : > { %988 = vmatpush3.bf16.msra.mxu1 %v1062_v41 }
  0x38   : > { %719 = vmatpush1.bf16.msra.mxu0 %v1059_v40  ;;  %989 = vmatprep.subr.bf16.mxu1 %v1083_v1 }
  0x39   : > { %720 = vmatprep.subr.bf16.mxu0 %v1065_v42  ;;  %v938_v42 = vld [vmem:[%s1337_s4] ss:$0 sm:$0xff] }
  0x3b   : > { %990 = vmatpush3.bf16.msra.mxu1 %v1066_v44 }
  0x3c   : > { %721 = vmatpush1.bf16.msra.mxu0 %v1063_v43  ;;  %991 = vmatprep.subr.bf16.mxu1 %v1083_v1 }
  0x3d   : > { %722 = vmatprep.subr.bf16.mxu0 %v1069_v45 }
  0x3f   : > { %992 = vmatpush3.bf16.msra.mxu1 %v1070_v47 }
  0x40   : > { %723 = vmatpush1.bf16.msra.mxu0 %v1067_v46  ;;  %993 = vmatprep.subr.bf16.mxu1 %v1083_v1 }
  0x41   : > { %724 = vmatprep.subr.bf16.mxu0 %v1073_v48 }
  0x43   : > { %994 = vmatpush3.bf16.msra.mxu1 %v1074_v50 }
  0x44   : > { %725 = vmatpush1.bf16.msra.mxu0 %v1071_v49 }
  0xf9   : > { %v505_v55 = vpop.f32.mrb[0].mxu1 }
  0xfa   : > { %v517_v57 = vrot.slane %v505_v55, 1  ;;  %v462_v58 = vpop.f32.mrb[0].mxu0  ;;  %v977_v59 = vpop.f32.mrb[1].mxu1 }
  0xfb   : > { %v464_v60 = vpop.f32.mrb[1].mxu0  ;;  %v508_v61 = vpop.f32.mrb[2].mxu1  ;;  %v512_v2 = vrot.slane %v462_v58, 7 }
  0xfc   : > { %v518_v62 = vrot.slane %v508_v61, 1  ;;  %v466_v63 = vpop.f32.mrb[2].mxu0  ;;  %v978_v0 = vpop.f32.mrb[3].mxu1 }
  0xfd   : > { %v513_v4 = vrot.slane %v466_v63, 7  ;;  %v468_v5 = vpop.f32.mrb[3].mxu0 }
  0xfe   : > { %v520_v6 = vsel %vm519_vm1, %v517_v57, %v518_v62  ;;  %v521_v7 = vsel %vm519_vm1, %v518_v62, %v517_v57 }
  0xff   : > { %v516_v8 = vsel %vm514_vm2, %v513_v4, %v512_v2  ;;  %v515_v9 = vsel %vm514_vm2, %v512_v2, %v513_v4  ;;  %v535_v10 = vsel %vm1296_vm3, %v521_v7, 0.0 }
 0x100   : > { %v526_v11 = vsel %vm1300_vm4, %v516_v8, 0.0  ;;  %v529_v12 = vadd.f32 %v515_v9, %v468_v5 }
 0x101   : > { %v528_v13 = vadd.f32 %v526_v11, %v464_v60 }
 0x102   : > { %v537_v15 = vadd.f32 %v535_v10, %v529_v12 }
 0x103   : > { %v536_v16 = vadd.f32 %v528_v13, %v520_v6 }
 0x104   : > { %v546_v17 = vadd.f32 %v913_v14, %v537_v15 }
 0x105   : > { %v545_v18 = vadd.f32 %v913_v14, %v536_v16 }
 0x106   : > { %v548_v19 = vmax.f32 %v546_v17, 0.0 }
 0x107   : > { %v547_v20 = vmax.f32 %v545_v18, 0.0 }
 0x109   : > { %v549_v21 = vpack.c.bf16 %v548_v19, %v547_v20 }
 0x10b   : > { %743 = vmatmul.mubr.bf16.vlgmr.msra.gmra.mrb[4].mxu0 %v549_v21  ;;  %996 = vmatmul.mubr.bf16.vlgmr.msra.gmra.mrb[4].mxu1 %v549_v21 }
 0x1de   : > { %v744_v22 = vpop.f32.mrb[4].mxu0  ;;  %v787_v23 = vpop.f32.mrb[4].mxu1 }
 0x1df   : > { %v746_v24 = vpop.f32.mrb[5].mxu0  ;;  %v997_v25 = vpop.f32.mrb[5].mxu1  ;;  %v794_v28 = vrot.slane %v744_v22, 7  ;;  %v798_v29 = vrot.slane %v787_v23, 1 }
 0x1e0   : > { %v748_v26 = vpop.f32.mrb[6].mxu0  ;;  %v790_v27 = vpop.f32.mrb[6].mxu1 }
 0x1e1   : > { %v795_v30 = vrot.slane %v748_v26, 7  ;;  %v799_v31 = vrot.slane %v790_v27, 1  ;;  %v750_v32 = vpop.f32.mrb[7].mxu0  ;;  %v998_v33 = vpop.f32.mrb[7].mxu1 }
 0x1e3   : > { %v797_v34 = vsel %vm514_vm2, %v795_v30, %v794_v28  ;;  %v800_v35 = vsel %vm519_vm1, %v798_v29, %v799_v31  ;;  %v796_v36 = vsel %vm514_vm2, %v794_v28, %v795_v30  ;;  %v801_v37 = vsel %vm519_vm1, %v799_v31, %v798_v29 }
 0x1e4   : > { %v802_v38 = vsel %vm1300_vm4, %v797_v34, 0.0  ;;  %v805_v39 = vadd.f32 %v796_v36, %v750_v32  ;;  %v807_v40 = vsel %vm1296_vm3, %v801_v37, 0.0 }
 0x1e5   : > { %v804_v41 = vadd.f32 %v802_v38, %v746_v24 }
 0x1e6   : > { %v809_v43 = vadd.f32 %v807_v40, %v805_v39 }
 0x1e7   : > { %v808_v44 = vadd.f32 %v804_v41, %v800_v35 }
 0x1e8   : > { %v818_v45 = vadd.f32 %v938_v42, %v809_v43 }
 0x1e9   : > { %v817_v46 = vadd.f32 %v938_v42, %v808_v44 }
 0x1ea   : > { %v820_v48 = vmax.f32 %v818_v45, 0.0 }
 0x1eb   : > { %v819_v47 = vmax.f32 %v817_v46, 0.0 }
 0x1ec   : > { %822 = vst [vmem:[%s226_s11 + $0x8] sm:$0xff] %v820_v48 }
 0x1ed   : > { %821 = vst [vmem:[%s226_s11] sm:$0xff] %v819_v47 }
 0x1ee PF: > { %s15_s18 = sadd.s32 1, %s1081_s18  }
 0x1ef   : > { %p12_p4 = scmp.ge.s32.totalorder %s15_s18, 4  }
 0x1f1   :  { %14 = sbr.rel (!%p12_p4) target bundleno = 1 (0x1), region = 70 }

</bundles_post_ra>
